<compile_context>
chip_gen: v5e
topology: v5e:2x2
jax: 0.10.0
libtpu: 0.0.40
codegen_flags: <defaults>
</compile_context>

<pallas_src>
import math
import numpy as np
import jax
import jax.numpy as jnp
from jax.experimental import pallas as pl
from jax.experimental.pallas import tpu as pltpu


# ----------------------------- diffusion schedule (host-side, numpy) -----------------------------

def cosine_beta_schedule(T, max_beta=0.999, s=0.008):
    def f(t, T, s):
        return np.cos((t / T + s) / (1 + s) * np.pi / 2) ** 2
    betas = []
    for t in range(T):
        a_t = f(t + 1, T, s)
        a_tm1 = f(t, T, s)
        betas.append(min(1 - a_t / a_tm1, max_beta))
    return np.array(betas, dtype=np.float64)


def prepare_diffusion_vars(num_timesteps):
    betas = cosine_beta_schedule(num_timesteps)
    alphas = 1.0 - betas
    alphas_bar = np.cumprod(alphas, axis=0)
    return np.sqrt(alphas_bar), np.sqrt(1.0 - alphas_bar)


# ----------------------------- Pallas kernel -----------------------------

def _make_kernel(B, C, HW):
    inv_total = 1.0 / float(B * C * HW)

    def kernel(mean_ref, std_ref,           # (B,1,1) per-batch diffusion scalars (VMEM)
               x0_ref, noise_ref,           # (B,C,HW) VMEM slabs
               wcols_ref, temb_ref,         # (C,C,1) W columns, (B,C,1) timestep bias
               vpred_ref, loss_ref):        # outputs: (B,C,HW) v_pred, (1,1) loss
        m = mean_ref[...]                   # sqrt(alpha_bar_t), (B,1,1)
        s = std_ref[...]                    # sqrt(1-alpha_bar_t), (B,1,1)
        x0 = x0_ref[...]                    # (B,C,HW)
        nz = noise_ref[...]                 # (B,C,HW)

        # 1) q_sample — per-batch scalars broadcast over (C, HW)
        x_t = x0 * m + nz * s

        # 2) synthetic 1x1-conv denoiser on the VPU, unrolled over input channels:
        #    d[b,i,:] = sum_c W[i,c] * x_t[b,c,:] + temb[b,i]
        #    wcols_ref[c] is W[:,c] laid out (C_out,1) sublane-major.
        w = wcols_ref[...]                  # (C_in, C_out, 1)
        d = w[0][None, :, :] * x_t[:, 0:1, :]
        for c in range(1, C):
            d = d + w[c][None, :, :] * x_t[:, c:c + 1, :]
        d = d + temb_ref[...]               # (B,C,1) broadcast over HW lanes

        vpred_ref[...] = d.astype(vpred_ref.dtype)

        # 3) V-target MSE — v_t never materialized to memory
        diff = d - (m * nz - s * x0)
        sq = diff * diff
        part = jnp.sum(sq, axis=0)                                         # (C, HW)
        part = jnp.sum(jnp.sum(part, axis=1, keepdims=True),
                       axis=0, keepdims=True)                              # (1, 1)
        loss_ref[...] = part * inv_total

    return kernel


def gaussian_diffusion_train_step(x_0, noise, t, W, temb,
                                  sqrt_alphas_bar, sqrt_one_minus_alphas_bar):
    """x_0, noise: NCHW f32 [B,C,H,W]; t: int32 [B]; W: [C,C]; temb: [B,C].

    Returns (v_pred [B,C,H,W], loss scalar) — the denoising output and the
    DDPM MSE loss, matching forward_train's observable results.
    """
    B, C, H, Wd = x_0.shape
    HW = H * Wd

    # glue: gather per-timestep diffusion scalars -> per-batch (B,1,1) vectors
    mean3 = jnp.asarray(sqrt_alphas_bar, jnp.float32)[t].reshape(B, 1, 1)
    std3 = jnp.asarray(sqrt_one_minus_alphas_bar, jnp.float32)[t].reshape(B, 1, 1)

    x0_f = x_0.reshape(B, C, HW)
    nz_f = noise.reshape(B, C, HW)
    temb3 = temb.reshape(B, C, 1)
    w_cols = jnp.transpose(W).reshape(C, C, 1)   # column c of W, sublane-major

    kernel = _make_kernel(B, C, HW)

    v_pred, loss = pl.pallas_call(
        kernel,
        grid=(1,),                                                  # single step: batch resident
        in_specs=[
            pl.BlockSpec((B, 1, 1), lambda i: (0, 0, 0)),           # mean
            pl.BlockSpec((B, 1, 1), lambda i: (0, 0, 0)),           # std
            pl.BlockSpec((B, C, HW), lambda i: (0, 0, 0)),          # x_0
            pl.BlockSpec((B, C, HW), lambda i: (0, 0, 0)),          # noise
            pl.BlockSpec((C, C, 1), lambda i: (0, 0, 0)),           # W columns
            pl.BlockSpec((B, C, 1), lambda i: (0, 0, 0)),           # temb
        ],
        out_specs=(
            pl.BlockSpec((B, C, HW), lambda i: (0, 0, 0)),          # denoising output (v_pred)
            pl.BlockSpec((1, 1), lambda i: (0, 0)),                 # loss
        ),
        out_shape=(
            jax.ShapeDtypeStruct((B, C, HW), jnp.float32),
            jax.ShapeDtypeStruct((1, 1), jnp.float32),
        ),
        compiler_params=pltpu.CompilerParams(
            dimension_semantics=("arbitrary",)),
    )(mean3, std3, x0_f, nz_f, w_cols, temb3)

    return v_pred.reshape(B, C, H, Wd), loss[0, 0]


# ----------------------------- pure-JAX reference -----------------------------

def reference(x_0, noise, t, W, temb, sab, s1mab):
    m = jnp.asarray(sab, jnp.float32)[t][:, None, None, None]
    s = jnp.asarray(s1mab, jnp.float32)[t][:, None, None, None]
    x_t = x_0 * m + noise * s
    B, C, H, Wd = x_0.shape
    xt2 = x_t.reshape(B, C, H * Wd)
    d = jnp.einsum('ij,bjk->bik', W, xt2) + temb[:, :, None]
    d = d.reshape(B, C, H, Wd)
    v_t = m * noise - s * x_0
    loss = jnp.mean((d - v_t) ** 2)
    return d, loss


# ----------------------------- main -----------------------------

if __name__ == "__main__":
    num_timesteps = 1000
    B, C, H, Wd = 2, 4, 16, 16

    sab, s1mab = prepare_diffusion_vars(num_timesteps)

    key = jax.random.PRNGKey(0)
    k0, k1, k2, k3 = jax.random.split(key, 4)

    x_0 = jax.random.normal(k0, (B, C, H, Wd), dtype=jnp.float32)
    noise = jax.random.normal(k1, (B, C, H, Wd), dtype=jnp.float32)      # _get_noise_batch stand-in
    t = jax.random.randint(k2, (B,), 0, num_timesteps, dtype=jnp.int32)  # UniformTimeStepSampler stand-in

    # deterministic synthetic denoiser params (1x1 conv weight + sinusoidal timestep embedding)
    W = (0.5 * jnp.eye(C, dtype=jnp.float32)
         + 0.01 * jax.random.normal(k3, (C, C), dtype=jnp.float32))
    freqs = jnp.arange(C, dtype=jnp.float32) + 1.0
    temb = jnp.sin(t[:, None].astype(jnp.float32) * freqs[None, :] * (math.pi / num_timesteps))

    v_pred, loss = gaussian_diffusion_train_step(x_0, noise, t, W, temb, sab, s1mab)
    jax.block_until_ready((v_pred, loss))

    v_ref, loss_ref = reference(x_0, noise, t, W, temb, sab, s1mab)
    np.testing.assert_allclose(np.asarray(v_pred), np.asarray(v_ref), rtol=1e-4, atol=1e-4)
    np.testing.assert_allclose(float(loss), float(loss_ref), rtol=1e-4, atol=1e-5)

    print("KERNEL_OK")
</pallas_src>

<mosaic_0001>
module attributes {stable_mosaic.version = 11 : i64} {
  func.func @kernel(%arg0: i32, %arg1: memref<2x1x1xf32, #tpu.memory_space<vmem>>, %arg2: memref<2x1x1xf32, #tpu.memory_space<vmem>>, %arg3: memref<2x4x256xf32, #tpu.memory_space<vmem>>, %arg4: memref<2x4x256xf32, #tpu.memory_space<vmem>>, %arg5: memref<4x4x1xf32, #tpu.memory_space<vmem>>, %arg6: memref<2x4x1xf32, #tpu.memory_space<vmem>>, %arg7: memref<2x4x256xf32, #tpu.memory_space<vmem>>, %arg8: memref<1x1xf32, #tpu.memory_space<vmem>>) attributes {dimension_semantics = [#tpu.dimension_semantics<arbitrary>], iteration_bounds = array<i64: 1>, scalar_prefetch = 0 : i64, scratch_operands = 0 : i64, tpu.core_type = #tpu.core_type<tc>, window_params = [{pipeline_mode = #tpu.pipeline_mode<synchronous>, transform_indices = @transform_0, window_bounds = array<i64: 2, 1, 1>}, {pipeline_mode = #tpu.pipeline_mode<synchronous>, transform_indices = @transform_1, window_bounds = array<i64: 2, 1, 1>}, {pipeline_mode = #tpu.pipeline_mode<synchronous>, transform_indices = @transform_2, window_bounds = array<i64: 2, 4, 256>}, {pipeline_mode = #tpu.pipeline_mode<synchronous>, transform_indices = @transform_3, window_bounds = array<i64: 2, 4, 256>}, {pipeline_mode = #tpu.pipeline_mode<synchronous>, transform_indices = @transform_4, window_bounds = array<i64: 4, 4, 1>}, {pipeline_mode = #tpu.pipeline_mode<synchronous>, transform_indices = @transform_5, window_bounds = array<i64: 2, 4, 1>}, {pipeline_mode = #tpu.pipeline_mode<synchronous>, transform_indices = @transform_6, window_bounds = array<i64: 2, 4, 256>}, {pipeline_mode = #tpu.pipeline_mode<synchronous>, transform_indices = @transform_7, window_bounds = array<i64: 1, 1>}]} {
    %c0 = arith.constant 0 : index
    %c0_0 = arith.constant 0 : index
    %c0_1 = arith.constant 0 : index
    %0 = vector.load %arg1[%c0, %c0_0, %c0_1] : memref<2x1x1xf32, #tpu.memory_space<vmem>>, vector<2x1x1xf32>
    %c0_2 = arith.constant 0 : index
    %c0_3 = arith.constant 0 : index
    %c0_4 = arith.constant 0 : index
    %1 = vector.load %arg2[%c0_2, %c0_3, %c0_4] : memref<2x1x1xf32, #tpu.memory_space<vmem>>, vector<2x1x1xf32>
    %c0_5 = arith.constant 0 : index
    %c0_6 = arith.constant 0 : index
    %c0_7 = arith.constant 0 : index
    %2 = vector.load %arg3[%c0_5, %c0_6, %c0_7] : memref<2x4x256xf32, #tpu.memory_space<vmem>>, vector<2x4x256xf32>
    %c0_8 = arith.constant 0 : index
    %c0_9 = arith.constant 0 : index
    %c0_10 = arith.constant 0 : index
    %3 = vector.load %arg4[%c0_8, %c0_9, %c0_10] : memref<2x4x256xf32, #tpu.memory_space<vmem>>, vector<2x4x256xf32>
    %4 = vector.broadcast %0 : vector<2x1x1xf32> to vector<2x4x256xf32>
    %5 = arith.mulf %2, %4 : vector<2x4x256xf32>
    %6 = vector.broadcast %1 : vector<2x1x1xf32> to vector<2x4x256xf32>
    %7 = arith.mulf %3, %6 : vector<2x4x256xf32>
    %8 = arith.addf %5, %7 : vector<2x4x256xf32>
    %c0_11 = arith.constant 0 : index
    %c0_12 = arith.constant 0 : index
    %c0_13 = arith.constant 0 : index
    %9 = vector.load %arg5[%c0_11, %c0_12, %c0_13] : memref<4x4x1xf32, #tpu.memory_space<vmem>>, vector<4x4x1xf32>
    %10 = vector.extract_strided_slice %9 {offsets = [0, 0, 0], sizes = [1, 4, 1], strides = [1, 1, 1]} : vector<4x4x1xf32> to vector<1x4x1xf32>
    %11 = vector.shape_cast %10 : vector<1x4x1xf32> to vector<4x1xf32>
    %12 = vector.shape_cast %11 : vector<4x1xf32> to vector<1x4x1xf32>
    %13 = vector.extract_strided_slice %8 {offsets = [0, 0, 0], sizes = [2, 1, 256], strides = [1, 1, 1]} : vector<2x4x256xf32> to vector<2x1x256xf32>
    %14 = vector.broadcast %12 : vector<1x4x1xf32> to vector<2x4x256xf32>
    %15 = vector.broadcast %13 : vector<2x1x256xf32> to vector<2x4x256xf32>
    %16 = arith.mulf %14, %15 : vector<2x4x256xf32>
    %17 = vector.extract_strided_slice %9 {offsets = [1, 0, 0], sizes = [1, 4, 1], strides = [1, 1, 1]} : vector<4x4x1xf32> to vector<1x4x1xf32>
    %18 = vector.shape_cast %17 : vector<1x4x1xf32> to vector<4x1xf32>
    %19 = vector.shape_cast %18 : vector<4x1xf32> to vector<1x4x1xf32>
    %20 = vector.extract_strided_slice %8 {offsets = [0, 1, 0], sizes = [2, 1, 256], strides = [1, 1, 1]} : vector<2x4x256xf32> to vector<2x1x256xf32>
    %21 = vector.broadcast %19 : vector<1x4x1xf32> to vector<2x4x256xf32>
    %22 = vector.broadcast %20 : vector<2x1x256xf32> to vector<2x4x256xf32>
    %23 = arith.mulf %21, %22 : vector<2x4x256xf32>
    %24 = arith.addf %16, %23 : vector<2x4x256xf32>
    %25 = vector.extract_strided_slice %9 {offsets = [2, 0, 0], sizes = [1, 4, 1], strides = [1, 1, 1]} : vector<4x4x1xf32> to vector<1x4x1xf32>
    %26 = vector.shape_cast %25 : vector<1x4x1xf32> to vector<4x1xf32>
    %27 = vector.shape_cast %26 : vector<4x1xf32> to vector<1x4x1xf32>
    %28 = vector.extract_strided_slice %8 {offsets = [0, 2, 0], sizes = [2, 1, 256], strides = [1, 1, 1]} : vector<2x4x256xf32> to vector<2x1x256xf32>
    %29 = vector.broadcast %27 : vector<1x4x1xf32> to vector<2x4x256xf32>
    %30 = vector.broadcast %28 : vector<2x1x256xf32> to vector<2x4x256xf32>
    %31 = arith.mulf %29, %30 : vector<2x4x256xf32>
    %32 = arith.addf %24, %31 : vector<2x4x256xf32>
    %33 = vector.extract_strided_slice %9 {offsets = [3, 0, 0], sizes = [1, 4, 1], strides = [1, 1, 1]} : vector<4x4x1xf32> to vector<1x4x1xf32>
    %34 = vector.shape_cast %33 : vector<1x4x1xf32> to vector<4x1xf32>
    %35 = vector.shape_cast %34 : vector<4x1xf32> to vector<1x4x1xf32>
    %36 = vector.extract_strided_slice %8 {offsets = [0, 3, 0], sizes = [2, 1, 256], strides = [1, 1, 1]} : vector<2x4x256xf32> to vector<2x1x256xf32>
    %37 = vector.broadcast %35 : vector<1x4x1xf32> to vector<2x4x256xf32>
    %38 = vector.broadcast %36 : vector<2x1x256xf32> to vector<2x4x256xf32>
    %39 = arith.mulf %37, %38 : vector<2x4x256xf32>
    %40 = arith.addf %32, %39 : vector<2x4x256xf32>
    %c0_14 = arith.constant 0 : index
    %c0_15 = arith.constant 0 : index
    %c0_16 = arith.constant 0 : index
    %41 = vector.load %arg6[%c0_14, %c0_15, %c0_16] : memref<2x4x1xf32, #tpu.memory_space<vmem>>, vector<2x4x1xf32>
    %42 = vector.broadcast %41 : vector<2x4x1xf32> to vector<2x4x256xf32>
    %43 = arith.addf %40, %42 : vector<2x4x256xf32>
    %c0_17 = arith.constant 0 : index
    %c0_18 = arith.constant 0 : index
    %c0_19 = arith.constant 0 : index
    %44 = vector.load %arg7[%c0_17, %c0_18, %c0_19] : memref<2x4x256xf32, #tpu.memory_space<vmem>>, vector<2x4x256xf32>
    tpu.vector_store %arg7[%c0_17, %c0_18, %c0_19], %43 {strides = array<i32>} : memref<2x4x256xf32, #tpu.memory_space<vmem>>, vector<2x4x256xf32>,
    %45 = vector.broadcast %0 : vector<2x1x1xf32> to vector<2x4x256xf32>
    %46 = arith.mulf %45, %3 : vector<2x4x256xf32>
    %47 = vector.broadcast %1 : vector<2x1x1xf32> to vector<2x4x256xf32>
    %48 = arith.mulf %47, %2 : vector<2x4x256xf32>
    %49 = arith.subf %46, %48 : vector<2x4x256xf32>
    %50 = arith.subf %43, %49 : vector<2x4x256xf32>
    %51 = arith.mulf %50, %50 : vector<2x4x256xf32>
    %cst = arith.constant dense<0.000000e+00> : vector<4x256xf32>
    %52 = vector.multi_reduction <add>, %51, %cst [0] : vector<2x4x256xf32> to vector<4x256xf32>
    %cst_20 = arith.constant dense<0.000000e+00> : vector<4xf32>
    %53 = vector.multi_reduction <add>, %52, %cst_20 [1] : vector<4x256xf32> to vector<4xf32>
    %54 = vector.shape_cast %53 : vector<4xf32> to vector<4x1xf32>
    %cst_21 = arith.constant dense<0.000000e+00> : vector<1xf32>
    %55 = vector.multi_reduction <add>, %54, %cst_21 [0] : vector<4x1xf32> to vector<1xf32>
    %56 = vector.shape_cast %55 : vector<1xf32> to vector<1x1xf32>
    %cst_22 = arith.constant 4.8828125E-4 : f32
    %57 = vector.broadcast %cst_22 : f32 to vector<1x1xf32>
    %58 = arith.mulf %56, %57 : vector<1x1xf32>
    %c0_23 = arith.constant 0 : index
    %c0_24 = arith.constant 0 : index
    %59 = vector.load %arg8[%c0_23, %c0_24] : memref<1x1xf32, #tpu.memory_space<vmem>>, vector<1x1xf32>
    tpu.vector_store %arg8[%c0_23, %c0_24], %58 {strides = array<i32>} : memref<1x1xf32, #tpu.memory_space<vmem>>, vector<1x1xf32>,
    return
  }
  func.func @transform_0(%arg0: i32) -> (i32, i32, i32) {
    %c0_i32 = arith.constant 0 : i32
    %c0_i32_0 = arith.constant 0 : i32
    %c0_i32_1 = arith.constant 0 : i32
    %c0_i32_2 = arith.constant 0 : i32
    return %c0_i32, %c0_i32_0, %c0_i32_1 : i32, i32, i32
  }
  func.func @transform_1(%arg0: i32) -> (i32, i32, i32) {
    %c0_i32 = arith.constant 0 : i32
    %c0_i32_0 = arith.constant 0 : i32
    %c0_i32_1 = arith.constant 0 : i32
    %c0_i32_2 = arith.constant 0 : i32
    return %c0_i32, %c0_i32_0, %c0_i32_1 : i32, i32, i32
  }
  func.func @transform_2(%arg0: i32) -> (i32, i32, i32) {
    %c0_i32 = arith.constant 0 : i32
    %c0_i32_0 = arith.constant 0 : i32
    %c0_i32_1 = arith.constant 0 : i32
    %c0_i32_2 = arith.constant 0 : i32
    return %c0_i32, %c0_i32_0, %c0_i32_1 : i32, i32, i32
  }
  func.func @transform_3(%arg0: i32) -> (i32, i32, i32) {
    %c0_i32 = arith.constant 0 : i32
    %c0_i32_0 = arith.constant 0 : i32
    %c0_i32_1 = arith.constant 0 : i32
    %c0_i32_2 = arith.constant 0 : i32
    return %c0_i32, %c0_i32_0, %c0_i32_1 : i32, i32, i32
  }
  func.func @transform_4(%arg0: i32) -> (i32, i32, i32) {
    %c0_i32 = arith.constant 0 : i32
    %c0_i32_0 = arith.constant 0 : i32
    %c0_i32_1 = arith.constant 0 : i32
    %c0_i32_2 = arith.constant 0 : i32
    return %c0_i32, %c0_i32_0, %c0_i32_1 : i32, i32, i32
  }
  func.func @transform_5(%arg0: i32) -> (i32, i32, i32) {
    %c0_i32 = arith.constant 0 : i32
    %c0_i32_0 = arith.constant 0 : i32
    %c0_i32_1 = arith.constant 0 : i32
    %c0_i32_2 = arith.constant 0 : i32
    return %c0_i32, %c0_i32_0, %c0_i32_1 : i32, i32, i32
  }
  func.func @transform_6(%arg0: i32) -> (i32, i32, i32) {
    %c0_i32 = arith.constant 0 : i32
    %c0_i32_0 = arith.constant 0 : i32
    %c0_i32_1 = arith.constant 0 : i32
    %c0_i32_2 = arith.constant 0 : i32
    return %c0_i32, %c0_i32_0, %c0_i32_1 : i32, i32, i32
  }
  func.func @transform_7(%arg0: i32) -> (i32, i32) {
    %c0_i32 = arith.constant 0 : i32
    %c0_i32_0 = arith.constant 0 : i32
    %c0_i32_1 = arith.constant 0 : i32
    return %c0_i32, %c0_i32_0 : i32, i32
  }
}

</mosaic_0001>

<bundles_post_ra>
// kernel: tpu_custom_call.1
= control target key start
LH: loop header
LB: loop body
LE: loop exit
PB: predicated region body
PF: predicated region fallthrough
CT: control target
= control target key end

     0   :  { %13 = vsyncpa [#allocation3], 0  ;;  %s498_s0 = inlined_call_operand.vmem [shape: f32[2,1,1], index: 0, kind: input, shape index: {}]   ;;  %s499_s1 = inlined_call_operand.vmem [shape: f32[2,1,1], index: 1, kind: input, shape index: {}]   ;;  %s500_s2 = inlined_call_operand.vmem [shape: f32[2,4,256], index: 2, kind: input, shape index: {}]   ;;  %s501_s3 = inlined_call_operand.hbm [shape: f32[2,4,256], index: 3, kind: input, shape index: {}]   ;;  %s502_s4 = inlined_call_operand.vmem [shape: f32[4,4,1], index: 4, kind: input, shape index: {}]   ;;  %s503_s5 = inlined_call_operand.vmem [shape: f32[2,4,1], index: 5, kind: input, shape index: {}]   ;;  %s504_s6 = inlined_call_operand.hbm [shape: f32[2,4,256], index: 6, kind: output, shape index: {0}]   ;;  %s505_s7 = inlined_call_operand.hbm [shape: f32[1,1], index: 7, kind: output, shape index: {1}]  }
   0x1   :  { %14 = vsyncpa [#allocation4], 0 }
   0x2   :  { %15 = vsyncpa [#allocation7], 0  ;;  %s26_s26 = sshll.u32 %s501_s3, 4  ;;  %s386_s27 = smov [#allocation2]   ;;  %s27_s26 = int_to_ptr.hbm [resolvable:$true] %s26_s26 }
   0x3   :  { %s28_s28 = sshll.u32 %s386_s27, 4  ;;  %s387_s29 = smov 128   ;;  %s29_s28 = int_to_ptr.vmem [resolvable:$true] %s28_s28 }
   0x4   :  { %s388_s30 = smov 8  }
   0x5   :  { %34 = dma.hbm_to_vmem [thread:$0]  %s27_s26, 256, %s29_s28, [#allocation3], %s387_s29, %s387_s29, %s388_s30  }
   0x6   :  { %380 = dma.done.wait [#allocation3], 256  }
   0x7   :  { %381 = vsyncadd [#allocation3], 4294967040  ;;  %v389_v0 = vmov 0   ;;  %v304_v1 = vld [vmem:[%s499_s1] ss:$0 sm:$0xff]  ;;  %v49_v12 = vld [vmem:[#allocation2] sm:$0xff] }
   0x8   :  { %302 = vset.pattern.permute.xlu1 %v389_v0  ;;  %301 = vset.pattern.permute.xlu0 %v389_v0  ;;  %v305_v2 = vld [vmem:[%s498_s0] ss:$0 sm:$0xff]  ;;  %v306_v4 = vld [vmem:[%s499_s1 + $0x1] ss:$0 sm:$0xff]  ;;  %v82_v6 = vld [vmem:[%s502_s4 + $0x4] sm:$0xf] }
   0x9   :  { %303 = vset.pattern.permute.xlu2 %v389_v0  ;;  %70 = vperm.xlu1 %302, %v304_v1   ;;  %v81_v3 = vld [vmem:[%s502_s4] sm:$0xf]  ;;  %v84_v7 = vld [vmem:[%s502_s4 + $0xc] sm:$0xf]  ;;  %v83_v8 = vld [vmem:[%s502_s4 + $0x8] sm:$0xf] }
   0xa   :  { %56 = vperm.xlu0 %301, %v305_v2   ;;  %87 = vperm.xlu2 %303, %v81_v3   ;;  %v307_v5 = vld [vmem:[%s498_s0 + $0x1] ss:$0 sm:$0xff]  ;;  %v184_v10 = vld [vmem:[%s503_s5 + $0x4] sm:$0xf]  ;;  %v48_v22 = vld [vmem:[%s500_s2 + $0x8] sm:$0xff]  ;;  %vm205_vm0 = vcmask 1043456  }
   0xb   :  { %v183_v9 = vld [vmem:[%s503_s5] sm:$0xf]  ;;  %v50_v23 = vld [vmem:[#allocation2 + $0x8] sm:$0xff]  ;;  %s266_s28 = sshll.u32 %s504_s6, 4  ;;  %s390_s8 = smov [#allocation5]   ;;  %vm258_vm1 = vcmask 0   ;;  %s267_s28 = int_to_ptr.hbm [resolvable:$true] %s266_s28 }
   0xc   :  { %v47_v11 = vld [vmem:[%s500_s2] sm:$0xff]  ;;  %s264_s9 = sshll.u32 %s390_s8, 4  ;;  %s391_s3 = smov [#allocation6]   ;;  %s265_s9 = int_to_ptr.vmem [resolvable:$true] %s264_s9 }
   0xd   :  { %s278_s10 = sshll.u32 %s391_s3, 4  ;;  %s280_s12 = sshll.u32 %s505_s7, 4  ;;  %s279_s10 = int_to_ptr.vmem [resolvable:$true] %s278_s10  ;;  %s281_s12 = int_to_ptr.hbm [resolvable:$true] %s280_s12 }
  0x11   :  { %74 = vperm.xlu1 %302, %v306_v4  }
  0x12   :  { %60 = vperm.xlu0 %301, %v307_v5   ;;  %110 = vperm.xlu2 %303, %v82_v6  }
  0x19   :  { %160 = vperm.xlu1 %302, %v84_v7  }
  0x1a   :  { %135 = vperm.xlu0 %301, %v83_v8   ;;  %187 = vperm.xlu2 %303, %v183_v9  }
  0x22   :  { %192 = vperm.xlu0 %301, %v184_v10  }
  0x64   :  { %v471_v13 = vpop.permute.xlu2 %87 }
  0x6c   :  { %v111_v40 = vpop.permute.xlu2 %110 }
  0x7b   :  { %v71_v14 = vpop.permute.xlu1 %70 }
  0x7c   :  { %v77_v15 = vmul.f32 %v71_v14, %v49_v12  ;;  %v214_v16 = vmul.f32 %v71_v14, %v47_v11  ;;  %v57_v17 = vpop.permute.xlu0 %56 }
  0x7d   :  { %v63_v18 = vmul.f32 %v57_v17, %v47_v11  ;;  %v212_v19 = vmul.f32 %v57_v17, %v49_v12 }
  0x7f   :  { %v79_v20 = vadd.f32 %v77_v15, %v63_v18  ;;  %v216_v21 = vsub.f32 %v212_v19, %v214_v16 }
  0x81   :  { %220 = vst [vmem:[#allocation1] ss:$2 sm:$0xff] %v216_v21  ;;  %v92_v24 = vperm.slane %v79_v20, 0  ;;  %v93_v25 = vperm.slane %v79_v20, 4  ;;  %v163_v26 = vperm.slane %v79_v20, 3  ;;  %v164_v27 = vperm.slane %v79_v20, 7 }
  0x82   :  { %v113_v28 = vperm.slane %v79_v20, 1  ;;  %v114_v29 = vperm.slane %v79_v20, 5  ;;  %v138_v33 = vperm.slane %v79_v20, 2  ;;  %v139_v34 = vperm.slane %v79_v20, 6 }
  0x83   :  { %v75_v30 = vpop.permute.xlu1 %74  ;;  %v100_v31 = vperm.slane %v92_v24, 0  ;;  %v101_v32 = vperm.slane %v93_v25, 0  ;;  %v171_v49 = vperm.slane %v163_v26, 3  ;;  %v172_v50 = vperm.slane %v164_v27, 3  ;;  %v188_v26 = vpop.permute.xlu2 %187 }
  0x84   :  { %v78_v35 = vmul.f32 %v75_v30, %v50_v23  ;;  %v215_v36 = vmul.f32 %v75_v30, %v48_v22  ;;  %v61_v37 = vpop.permute.xlu0 %60  ;;  %v121_v38 = vperm.slane %v113_v28, 1  ;;  %v122_v39 = vperm.slane %v114_v29, 1 }
  0x85   :  { %v64_v41 = vmul.f32 %v61_v37, %v48_v22  ;;  %v213_v42 = vmul.f32 %v61_v37, %v50_v23  ;;  %v104_v43 = vmul.f32 %v100_v31, %v471_v13  ;;  %v105_v44 = vmul.f32 %v101_v32, %v471_v13 }
  0x86   :  { %v125_v45 = vmul.f32 %v121_v38, %v111_v40  ;;  %v126_v46 = vmul.f32 %v122_v39, %v111_v40  ;;  %v146_v51 = vperm.slane %v138_v33, 2  ;;  %v147_v52 = vperm.slane %v139_v34, 2 }
  0x87   :  { %v80_v47 = vadd.f32 %v78_v35, %v64_v41  ;;  %v217_v48 = vsub.f32 %v213_v42, %v215_v36 }
  0x88   :  { %v129_v57 = vadd.f32 %v125_v45, %v104_v43  ;;  %v130_v58 = vadd.f32 %v126_v46, %v105_v44  ;;  %v221_v35 = vld.sshfl [vmem:[#allocation1] sm:$0xff pattern:$0x75316420]  ;;  %v222_v36 = vld.sshfl [vmem:[#allocation1 + $0x8] sm:$0xff pattern:$0x75316420] }
  0x89   :  { %224 = vst [vmem:[#allocation1 + $0x10] ss:$2 sm:$0xff] %v217_v48  ;;  %v140_v53 = vperm.slane %v80_v47, 2  ;;  %v141_v54 = vperm.slane %v80_v47, 6  ;;  %v94_v55 = vperm.slane %v80_v47, 0  ;;  %v95_v56 = vperm.slane %v80_v47, 4 }
  0x8a   :  { %v115_v59 = vperm.slane %v80_v47, 1  ;;  %v116_v60 = vperm.slane %v80_v47, 5  ;;  %v165_v0 = vperm.slane %v80_v47, 3  ;;  %v166_v1 = vperm.slane %v80_v47, 7 }
  0x8b   :  { %v161_v61 = vpop.permute.xlu1 %160  ;;  %v102_v62 = vperm.slane %v94_v55, 0  ;;  %v103_v63 = vperm.slane %v95_v56, 0  ;;  %v148_v2 = vperm.slane %v140_v53, 2  ;;  %v149_v3 = vperm.slane %v141_v54, 2 }
  0x8c   :  { %v136_v4 = vpop.permute.xlu0 %135  ;;  %v123_v5 = vperm.slane %v115_v59, 1  ;;  %v124_v6 = vperm.slane %v116_v60, 1  ;;  %v175_v7 = vmul.f32 %v171_v49, %v161_v61  ;;  %v176_v8 = vmul.f32 %v172_v50, %v161_v61 }
  0x8d   :  { %v150_v9 = vmul.f32 %v146_v51, %v136_v4  ;;  %v151_v10 = vmul.f32 %v147_v52, %v136_v4  ;;  %v106_v11 = vmul.f32 %v102_v62, %v471_v13  ;;  %v107_v12 = vmul.f32 %v103_v63, %v471_v13 }
  0x8e   :  { %v127_v14 = vmul.f32 %v123_v5, %v111_v40  ;;  %v128_v15 = vmul.f32 %v124_v6, %v111_v40  ;;  %v173_v18 = vperm.slane %v165_v0, 3  ;;  %v174_v19 = vperm.slane %v166_v1, 3 }
  0x8f   :  { %v154_v16 = vadd.f32 %v150_v9, %v129_v57  ;;  %v155_v17 = vadd.f32 %v151_v10, %v130_v58  ;;  %v152_v20 = vmul.f32 %v148_v2, %v136_v4  ;;  %v153_v21 = vmul.f32 %v149_v3, %v136_v4 }
  0x90   :  { %v131_v22 = vadd.f32 %v127_v14, %v106_v11  ;;  %v132_v23 = vadd.f32 %v128_v15, %v107_v12  ;;  %v177_v29 = vmul.f32 %v173_v18, %v161_v61  ;;  %v178_v30 = vmul.f32 %v174_v19, %v161_v61  ;;  %v225_v42 = vld.sshfl [vmem:[#allocation1 + $0x10] sm:$0xff pattern:$0x75316420]  ;;  %v226_v43 = vld.sshfl [vmem:[#allocation1 + $0x18] sm:$0xff pattern:$0x75316420] }
  0x91   :  { %v179_v24 = vadd.f32 %v175_v7, %v154_v16  ;;  %v180_v25 = vadd.f32 %v176_v8, %v155_v17 }
  0x92   :  { %v156_v27 = vadd.f32 %v152_v20, %v131_v22  ;;  %v157_v28 = vadd.f32 %v153_v21, %v132_v23 }
  0x93   :  { %v195_v31 = vadd.f32 %v188_v26, %v179_v24  ;;  %v196_v13 = vadd.f32 %v188_v26, %v180_v25 }
  0x94   :  { %v181_v32 = vadd.f32 %v177_v29, %v156_v27  ;;  %v182_v33 = vadd.f32 %v178_v30, %v157_v28  ;;  %v193_v34 = vpop.permute.xlu0 %192 }
  0x95   :  { %v231_v37 = vsub.f32 %v195_v31, %v221_v35  ;;  %v232_v38 = vsub.f32 %v196_v13, %v222_v36  ;;  %v203_v39 = vrot.slane %v196_v13, 4 }
  0x96   :  { %v197_v40 = vadd.f32 %v193_v34, %v181_v32  ;;  %v198_v41 = vadd.f32 %v193_v34, %v182_v33 }
  0x97   :  { %v235_v44 = vmul.f32 %v231_v37, %v231_v37  ;;  %v206_v45 = vsel %vm205_vm0, %v195_v31, %v203_v39  ;;  %v236_v49 = vmul.f32 %v232_v38, %v232_v38 }
  0x98   :  { %v204_v46 = vrot.slane %v198_v41, 4  ;;  %v233_v47 = vsub.f32 %v197_v40, %v225_v42  ;;  %v234_v48 = vsub.f32 %v198_v41, %v226_v43  ;;  %210 = vst [vmem:[#allocation5] sm:$0xff] %v206_v45 }
  0x99   :  { %v239_v55 = vsel %vm205_vm0, %v235_v44, 0.0  ;;  %v242_v56 = vsel %vm205_vm0, %v236_v49, 0.0 }
  0x9a   :  { %v207_v50 = vsel %vm205_vm0, %v197_v40, %v204_v46  ;;  %v237_v51 = vmul.f32 %v233_v47, %v233_v47  ;;  %v238_v52 = vmul.f32 %v234_v48, %v234_v48 }
  0x9b   :  { %211 = vst [vmem:[#allocation5 + $0x8] sm:$0xff] %v207_v50 }
  0x9c   :  { %v240_v53 = vsel %vm205_vm0, %v237_v51, 0.0  ;;  %v243_v54 = vsel %vm205_vm0, %v238_v52, 0.0  ;;  %272 = dma.vmem_to_hbm [thread:$0]  %s265_s9, 256, %s267_s28, [#allocation4], %s387_s29, %s387_s29, %s388_s30  }
  0x9d   :  { %v241_v57 = vadd.f32 %v240_v53, %v239_v55  ;;  %v244_v58 = vadd.f32 %v243_v54, %v242_v56 }
  0x9f   :  { %v245_v59 = vsel %vm205_vm0, %v241_v57, 0.0  ;;  %v246_v60 = vsel %vm205_vm0, %v244_v58, 0.0 }
  0xa0   :  { %v247_v61 = vadd.f32 %v246_v60, %v245_v59 }
  0xa2   :  { %248 = vadd.xlane.f32.xlu1 %v247_v61 }
 0x115   :  { %v249_v62 = vpop.xlane.xlu1 %248 }
 0x116   :  { %v250_v63 = vsel %vm205_vm0, %v249_v62, 0.0 }
 0x117   :  { %v251_v0 = vrot.slane %v250_v63, 4 }
 0x119   :  { %v252_v1 = vadd.f32 %v251_v0, %v250_v63 }
 0x11b   :  { %v253_v2 = vrot.slane %v252_v1, 2 }
 0x11d   :  { %v254_v3 = vadd.f32 %v253_v2, %v252_v1 }
 0x11f   :  { %v255_v4 = vrot.slane %v254_v3, 1 }
 0x121   :  { %v256_v5 = vadd.f32 %v255_v4, %v254_v3 }
 0x123   :  { %v257_v6 = vmul.f32 0.00048828125, %v256_v5 }
 0x125   :  { %259 = vst.msk [vmem:[#allocation6] sm:$0x1] %vm258_vm1, %v257_v6 }
 0x126   :  { %283 = dma.vmem_to_hbm [thread:$0]  %s279_s10, 16, %s281_s12, [#allocation7]  }
 0x127   :  { %382 = dma.done.wait [#allocation4], 256  }
 0x128   :  { %383 = vsyncadd [#allocation4], 4294967040 }
 0x129   :  { %384 = dma.done.wait [#allocation7], 16  }
 0x12a   :  { %385 = vsyncadd [#allocation7], 4294967280 }
 0x12b   :  { %292 = vsyncpa [#allocation3], 1 }
 0x12c   :  { %293 = vsyncpa [#allocation4], 1 }
 0x12d   :  { %294 = vsyncpa [#allocation7], 1 }

</bundles_post_ra>
